<compile_context>
chip_gen: v7x
topology: tpu7x:2x2x1
jax: 0.10.0
libtpu: 0.0.40
codegen_flags: <defaults>
</compile_context>

<pallas_src>
import functools
import math

import jax
import jax.numpy as jnp
from jax.experimental import pallas as pl
from jax.experimental.pallas import tpu as pltpu


# ---------------------------------------------------------------------------
# Small helpers
# ---------------------------------------------------------------------------
def _round_up(x, m):
    return ((x + m - 1) // m) * m


def _act(a, activation):
    if activation == "tanh":
        return jnp.tanh(a)
    if activation == "relu":
        return jnp.maximum(a, 0.0)
    return a  # "linear": used for the hoisted x @ W^T projection


def _vmem_limit_bytes(estimate_bytes):
    """Clamp the declared VMEM budget to the chip (v7x has only 64 MiB)."""
    try:
        cap = int(pltpu.get_tpu_info().vmem_capacity_bytes)
    except Exception:
        cap = 64 << 20  # v7x-safe lower bound
    return int(min(max(2 * estimate_bytes, 4 << 20), (3 * cap) // 4))


def _batch_tiling(n_rows, max_tile=512):
    """(tile, padded_rows): row tiles up to `max_tile` (bigger tiles get
    mem-bound kernels much closer to the HBM roofline), multiple of 8."""
    if n_rows <= max_tile:
        t = _round_up(n_rows, 8)
        return t, t
    return max_tile, _round_up(n_rows, max_tile)


def _pad_rows(a, rows):
    if a.shape[0] == rows:
        return a
    return jnp.pad(a, ((0, rows - a.shape[0]),) + ((0, 0),) * (a.ndim - 1))


def _weight_spec(block_shape, single_buffer):
    """Constant-index weight BlockSpec; single_buffer drops the (useless)
    second pipeline buffer so the weights occupy VMEM only once."""
    index_map = lambda *idx: (0,) * len(block_shape)
    if single_buffer:
        return pl.BlockSpec(block_shape, index_map, pipeline_mode=pl.Buffered(1))
    return pl.BlockSpec(block_shape, index_map)


def _with_weight_fallback(build):
    """build(single_buffer: bool) -> result.  Try single-buffered weights;
    fall back to default double-buffering if pl.Buffered(1) is rejected."""
    try:
        return build(True)
    except Exception:
        return build(False)


# ---------------------------------------------------------------------------
# Kernels
# ---------------------------------------------------------------------------
def _proj_kernel(x_ref, wT_ref, out_ref, *, activation):
    """out = act(x @ W^T) -- also used (activation='linear') for the hoisted
    sequence input projection."""
    a = jnp.dot(x_ref[...], wT_ref[...], preferred_element_type=jnp.float32)
    out_ref[...] = _act(a, activation).astype(out_ref.dtype)


def _cell_kernel(x_ref, b_ref, wT_ref, uT_ref, out_ref, *, activation):
    """out = act(x @ W^T + b_prev @ U^T): two accumulating MXU dots, no
    wrapper-side concatenated/padded activation slab."""
    a = jnp.dot(x_ref[...], wT_ref[...], preferred_element_type=jnp.float32)
    a += jnp.dot(b_ref[...], uT_ref[...], preferred_element_type=jnp.float32)
    out_ref[...] = _act(a, activation).astype(out_ref.dtype)


def _seq_kernel(xw_ref, uT_ref, out_ref, h_ref, *, activation, tt):
    """TT timesteps per grid step.  xw_ref holds the precomputed x@W^T block;
    only h@U^T + xw[t] + act runs on the serial recurrence path.  h is carried
    in f32 VMEM scratch across the 'arbitrary' time axis and reset at the
    start of each batch tile's time sweep."""
    @pl.when(pl.program_id(1) == 0)
    def _():
        h_ref[...] = jnp.zeros_like(h_ref)

    def step(i, carry):
        a = xw_ref[i].astype(jnp.float32) + jnp.dot(
            h_ref[...].astype(uT_ref.dtype), uT_ref[...],
            preferred_element_type=jnp.float32)
        h = _act(a, activation)
        h_ref[...] = h
        out_ref[i] = h.astype(out_ref.dtype)
        return carry

    jax.lax.fori_loop(0, tt, step, 0, unroll=True)


# ---------------------------------------------------------------------------
# Parameter packing (done ONCE, outside the per-step call)
# ---------------------------------------------------------------------------
def prepare_rnn_weights(W, U, param_dtype=jnp.float32):
    """Transpose to [K, N]; zero-pad only N (output / lane dim) to a multiple
    of 128 for full MXU columns and lane-dense unmasked stores.  K is left
    unpadded so activations are never inflated in HBM.  Use
    param_dtype=jnp.bfloat16 on v6e/v7x for 2x MXU rate and half the DMA
    bytes (accumulation stays f32; loosen reference tolerances)."""
    out_features, in_features = W.shape
    assert U.shape == (out_features, out_features), f"Wrong U size: {U.shape}"
    out_pad = _round_up(out_features, 128)
    # TODO(synk): on v6e/v7x consider padding N to multiples of 256 to fill
    # the 256-wide MXU when out_features < 256 and the kernel is MXU-bound.

    wT = jnp.zeros((in_features, out_pad), param_dtype)
    wT = wT.at[:, :out_features].set(jnp.asarray(W, param_dtype).T)
    uT = jnp.zeros((out_features, out_pad), param_dtype)
    uT = uT.at[:, :out_features].set(jnp.asarray(U, param_dtype).T)
    # Square (K-padded) copy for the sequence kernel, whose hidden state is
    # carried at the padded width (padded rows are zero -> no contribution).
    uT_sq = jnp.zeros((out_pad, out_pad), param_dtype)
    uT_sq = uT_sq.at[:out_features, :].set(uT)

    return {
        "in_features": in_features,
        "out_features": out_features,
        "out_pad": out_pad,
        "param_dtype": jnp.dtype(param_dtype),
        "wT": wT,         # [in_f,    out_pad]
        "uT": uT,         # [out_f,   out_pad]
        "uT_sq": uT_sq,   # [out_pad, out_pad]
    }


# ---------------------------------------------------------------------------
# Row-tiled projection:  rows @ W^T  (shared by cell fast path & sequence)
# ---------------------------------------------------------------------------
def _project(x2d, wT, activation, out_dtype):
    M, K = x2d.shape
    Kw, Np = wT.shape
    assert Kw == K
    tm, Mp = _batch_tiling(M)
    x_p = _pad_rows(x2d, Mp)

    est = (2 * tm * K * x2d.dtype.itemsize
           + 2 * K * Np * wT.dtype.itemsize
           + 2 * tm * Np * jnp.dtype(out_dtype).itemsize)

    def build(single_buffer):
        return pl.pallas_call(
            functools.partial(_proj_kernel, activation=activation),
            out_shape=jax.ShapeDtypeStruct((Mp, Np), out_dtype),
            grid=(Mp // tm,),
            in_specs=[
                pl.BlockSpec((tm, K), lambda i: (i, 0)),
                _weight_spec((K, Np), single_buffer),
            ],
            out_specs=pl.BlockSpec((tm, Np), lambda i: (i, 0)),
            compiler_params=pltpu.CompilerParams(
                dimension_semantics=("parallel",),
                vmem_limit_bytes=_vmem_limit_bytes(est),
            ),
        )(x_p, wT)

    return _with_weight_fallback(build)[:M]


# ---------------------------------------------------------------------------
# Single-cell forward (matches RNN.forward)
# ---------------------------------------------------------------------------
def rnn_forward(x, params, b_prev=None, non_linearity="tanh"):
    """act(x @ W^T + b_prev @ U^T); b_prev=None treated as zeros."""
    if non_linearity not in ("tanh", "relu"):
        raise ValueError(f"Unknown non_linearity: {non_linearity!r}")
    B, in_f = x.shape
    if in_f != params["in_features"]:
        raise ValueError(f"Wrong x size: {x.shape}")
    out_f = params["out_features"]
    out_pad = params["out_pad"]
    cdt = params["param_dtype"]
    out_dtype = x.dtype

    if b_prev is None:
        # Fast path: no recurrence -> single-matmul projection (U never
        # DMA'd, no dead matmul).
        out = _project(x.astype(cdt), params["wT"], non_linearity, out_dtype)
        return out[:, :out_f]

    if b_prev.shape != (B, out_f):
        raise ValueError(f"Wrong b size: {b_prev.shape}")

    tb, Bp = _batch_tiling(B)
    x_p = _pad_rows(x.astype(cdt), Bp)
    b_p = _pad_rows(b_prev.astype(cdt), Bp)

    itemsize = cdt.itemsize
    est = (2 * tb * (in_f + out_f) * itemsize
           + 2 * (in_f + out_f) * out_pad * itemsize
           + 2 * tb * out_pad * jnp.dtype(out_dtype).itemsize)

    def build(single_buffer):
        return pl.pallas_call(
            functools.partial(_cell_kernel, activation=non_linearity),
            out_shape=jax.ShapeDtypeStruct((Bp, out_pad), out_dtype),
            grid=(Bp // tb,),
            in_specs=[
                pl.BlockSpec((tb, in_f), lambda i: (i, 0)),
                pl.BlockSpec((tb, out_f), lambda i: (i, 0)),
                _weight_spec((in_f, out_pad), single_buffer),
                _weight_spec((out_f, out_pad), single_buffer),
            ],
            out_specs=pl.BlockSpec((tb, out_pad), lambda i: (i, 0)),
            compiler_params=pltpu.CompilerParams(
                dimension_semantics=("parallel",),
                vmem_limit_bytes=_vmem_limit_bytes(est),
            ),
        )(x_p, b_p, params["wT"], params["uT"])

    out = _with_weight_fallback(build)
    return out[:B, :out_f]


# ---------------------------------------------------------------------------
# Fused time-loop forward (input projection hoisted out of the serial loop)
# ---------------------------------------------------------------------------
def rnn_sequence(x_seq, params, non_linearity="tanh"):
    """x_seq: [T, B, in_features] -> [T, B, out_features] with h_0 = 0."""
    if non_linearity not in ("tanh", "relu"):
        raise ValueError(f"Unknown non_linearity: {non_linearity!r}")
    T, B, in_f = x_seq.shape
    if in_f != params["in_features"]:
        raise ValueError(f"Wrong x size: {x_seq.shape}")
    out_f = params["out_features"]
    out_pad = params["out_pad"]
    cdt = params["param_dtype"]
    out_dtype = x_seq.dtype

    tb, Bp = _batch_tiling(B, max_tile=256)

    # Hoisted input projection: one big [T*Bp, in_f] @ [in_f, out_pad] matmul
    # (MXU-efficient, off the serial critical path); result kept in f32.
    x_p = x_seq.astype(cdt)
    if Bp != B:
        x_p = jnp.pad(x_p, ((0, 0), (0, Bp - B), (0, 0)))
    xw = _project(x_p.reshape(T * Bp, in_f), params["wT"], "linear",
                  jnp.float32).reshape(T, Bp, out_pad)

    # TT timesteps per grid step to amortize per-step overhead.
    tt = min(16, T)
    while T % tt:
        tt -= 1

    itemsize = cdt.itemsize
    est = (2 * tt * tb * out_pad * 4                                 # xw blocks
           + 2 * out_pad * out_pad * itemsize                        # U^T
           + 2 * tt * tb * out_pad * jnp.dtype(out_dtype).itemsize   # out blocks
           + tb * out_pad * 4)                                       # h scratch

    def build(single_buffer):
        return pl.pallas_call(
            functools.partial(_seq_kernel, activation=non_linearity, tt=tt),
            out_shape=jax.ShapeDtypeStruct((T, Bp, out_pad), out_dtype),
            grid=(Bp // tb, T // tt),
            in_specs=[
                pl.BlockSpec((tt, tb, out_pad), lambda b, t: (t, b, 0)),
                _weight_spec((out_pad, out_pad), single_buffer),
            ],
            out_specs=pl.BlockSpec((tt, tb, out_pad), lambda b, t: (t, b, 0)),
            scratch_shapes=[pltpu.VMEM((tb, out_pad), jnp.float32)],
            compiler_params=pltpu.CompilerParams(
                # batch tiles independent (megacore on v7x); hidden state
                # carried across the time axis -> "arbitrary".
                dimension_semantics=("parallel", "arbitrary"),
                vmem_limit_bytes=_vmem_limit_bytes(est),
            ),
        )(xw, params["uT_sq"])

    out = _with_weight_fallback(build)
    return out[:, :B, :out_f]


# ---------------------------------------------------------------------------
# Init matching the PyTorch module: U(-sqrt(1/out), sqrt(1/out))
# ---------------------------------------------------------------------------
def init_rnn_params(key, in_features, out_features):
    bound = math.sqrt(1.0 / out_features)
    kw, ku = jax.random.split(key)
    W = jax.random.uniform(kw, (out_features, in_features),
                           minval=-bound, maxval=bound, dtype=jnp.float32)
    U = jax.random.uniform(ku, (out_features, out_features),
                           minval=-bound, maxval=bound, dtype=jnp.float32)
    return W, U


if __name__ == "__main__":
    in_features = 16
    out_features = 32
    batch = 8
    seq_len = 8

    key = jax.random.PRNGKey(0)
    k_params, k_x, k_b, k_seq = jax.random.split(key, 4)

    W, U = init_rnn_params(k_params, in_features, out_features)
    params = prepare_rnn_weights(W, U)          # transpose / N-pad ONCE

    x = jax.random.normal(k_x, (batch, in_features), dtype=jnp.float32)
    b_prev = jax.random.normal(k_b, (batch, out_features), dtype=jnp.float32)
    x_seq = jax.random.normal(k_seq, (seq_len, batch, in_features), dtype=jnp.float32)

    # Case 1: single cell, b_prev provided (tanh)
    out = jax.block_until_ready(rnn_forward(x, params, b_prev, "tanh"))
    ref = jnp.tanh(x @ W.T + b_prev @ U.T)
    assert out.shape == (batch, out_features)
    assert jnp.allclose(out, ref, atol=1e-5, rtol=1e-5), "cell tanh mismatch"

    # Case 2: b_prev=None (no-recurrence fast path: U never loaded)
    out0 = jax.block_until_ready(rnn_forward(x, params, None, "tanh"))
    ref0 = jnp.tanh(x @ W.T)
    assert jnp.allclose(out0, ref0, atol=1e-5, rtol=1e-5), "cell (no b_prev) mismatch"

    # Case 3: relu nonlinearity
    outr = jax.block_until_ready(rnn_forward(x, params, b_prev, "relu"))
    refr = jnp.maximum(x @ W.T + b_prev @ U.T, 0.0)
    assert jnp.allclose(outr, refr, atol=1e-5, rtol=1e-5), "cell relu mismatch"

    # Case 4: fused time-loop kernel vs lax.scan over the reference cell
    out_seq = jax.block_until_ready(rnn_sequence(x_seq, params, "tanh"))

    def step(h, xt):
        h_new = jnp.tanh(xt @ W.T + h @ U.T)
        return h_new, h_new

    _, ref_seq = jax.lax.scan(step, jnp.zeros((batch, out_features), jnp.float32), x_seq)
    assert out_seq.shape == (seq_len, batch, out_features)
    assert jnp.allclose(out_seq, ref_seq, atol=1e-4, rtol=1e-4), "sequence mismatch"

    print("KERNEL_OK")
</pallas_src>

<mosaic_0001>
module attributes {stable_mosaic.version = 11 : i64} {
  func.func @_cell_kernel(%arg0: i32, %arg1: memref<8x16xf32, #tpu.memory_space<vmem>>, %arg2: memref<8x32xf32, #tpu.memory_space<vmem>>, %arg3: memref<16x128xf32, #tpu.memory_space<vmem>>, %arg4: memref<32x128xf32, #tpu.memory_space<vmem>>, %arg5: memref<8x128xf32, #tpu.memory_space<vmem>>) attributes {dimension_semantics = [#tpu.dimension_semantics<parallel>], iteration_bounds = array<i64: 1>, scalar_prefetch = 0 : i64, scratch_operands = 0 : i64, tpu.core_type = #tpu.core_type<tc>, window_params = [{transform_indices = @transform_0, window_bounds = array<i64: 8, 16>}, {transform_indices = @transform_1, window_bounds = array<i64: 8, 32>}, {pipeline_mode = #tpu.pipeline_mode<synchronous>, transform_indices = @transform_2, window_bounds = array<i64: 16, 128>}, {pipeline_mode = #tpu.pipeline_mode<synchronous>, transform_indices = @transform_3, window_bounds = array<i64: 32, 128>}, {transform_indices = @transform_4, window_bounds = array<i64: 8, 128>}]} {
    %c0 = arith.constant 0 : index
    %c0_0 = arith.constant 0 : index
    %0 = vector.load %arg1[%c0, %c0_0] : memref<8x16xf32, #tpu.memory_space<vmem>>, vector<8x16xf32>
    %c0_1 = arith.constant 0 : index
    %c0_2 = arith.constant 0 : index
    %1 = vector.load %arg3[%c0_1, %c0_2] : memref<16x128xf32, #tpu.memory_space<vmem>>, vector<16x128xf32>
    %cst = arith.constant dense<0.000000e+00> : vector<8x128xf32>
    %2 = tpu.matmul %0, %1, %cst {dimension_numbers = #tpu.dot_dimension_numbers<[1], [0], [0], [1], [0, 0, 1, 1], [], []>} : vector<8x16xf32>, vector<16x128xf32>, vector<8x128xf32> -> vector<8x128xf32>
    %c0_3 = arith.constant 0 : index
    %c0_4 = arith.constant 0 : index
    %3 = vector.load %arg2[%c0_3, %c0_4] : memref<8x32xf32, #tpu.memory_space<vmem>>, vector<8x32xf32>
    %c0_5 = arith.constant 0 : index
    %c0_6 = arith.constant 0 : index
    %4 = vector.load %arg4[%c0_5, %c0_6] : memref<32x128xf32, #tpu.memory_space<vmem>>, vector<32x128xf32>
    %cst_7 = arith.constant dense<0.000000e+00> : vector<8x128xf32>
    %5 = tpu.matmul %3, %4, %cst_7 {dimension_numbers = #tpu.dot_dimension_numbers<[1], [0], [0], [1], [0, 0, 1, 1], [], []>} : vector<8x32xf32>, vector<32x128xf32>, vector<8x128xf32> -> vector<8x128xf32>
    %6 = arith.addf %2, %5 : vector<8x128xf32>
    %7 = math.tanh %6 : vector<8x128xf32>
    %c0_8 = arith.constant 0 : index
    %c0_9 = arith.constant 0 : index
    %8 = vector.load %arg5[%c0_8, %c0_9] : memref<8x128xf32, #tpu.memory_space<vmem>>, vector<8x128xf32>
    tpu.vector_store %arg5[%c0_8, %c0_9], %7 {strides = array<i32>} : memref<8x128xf32, #tpu.memory_space<vmem>>, vector<8x128xf32>,
    return
  }
  func.func @transform_0(%arg0: i32) -> (i32, i32) {
    %c0_i32 = arith.constant 0 : i32
    %c0_i32_0 = arith.constant 0 : i32
    return %arg0, %c0_i32 : i32, i32
  }
  func.func @transform_1(%arg0: i32) -> (i32, i32) {
    %c0_i32 = arith.constant 0 : i32
    %c0_i32_0 = arith.constant 0 : i32
    return %arg0, %c0_i32 : i32, i32
  }
  func.func @transform_2(%arg0: i32) -> (i32, i32) {
    %c0_i32 = arith.constant 0 : i32
    %c0_i32_0 = arith.constant 0 : i32
    %c0_i32_1 = arith.constant 0 : i32
    return %c0_i32, %c0_i32_0 : i32, i32
  }
  func.func @transform_3(%arg0: i32) -> (i32, i32) {
    %c0_i32 = arith.constant 0 : i32
    %c0_i32_0 = arith.constant 0 : i32
    %c0_i32_1 = arith.constant 0 : i32
    return %c0_i32, %c0_i32_0 : i32, i32
  }
  func.func @transform_4(%arg0: i32) -> (i32, i32) {
    %c0_i32 = arith.constant 0 : i32
    %c0_i32_0 = arith.constant 0 : i32
    return %arg0, %c0_i32 : i32, i32
  }
}

module attributes {stable_mosaic.version = 11 : i64} {
  func.func @_cell_kernel(%arg0: i32, %arg1: memref<8x16xf32, #tpu.memory_space<vmem>>, %arg2: memref<8x32xf32, #tpu.memory_space<vmem>>, %arg3: memref<16x128xf32, #tpu.memory_space<vmem>>, %arg4: memref<32x128xf32, #tpu.memory_space<vmem>>, %arg5: memref<8x128xf32, #tpu.memory_space<vmem>>) attributes {dimension_semantics = [#tpu.dimension_semantics<parallel>], iteration_bounds = array<i64: 1>, scalar_prefetch = 0 : i64, scratch_operands = 0 : i64, tpu.core_type = #tpu.core_type<tc>, window_params = [{transform_indices = @transform_0, window_bounds = array<i64: 8, 16>}, {transform_indices = @transform_1, window_bounds = array<i64: 8, 32>}, {pipeline_mode = #tpu.pipeline_mode<synchronous>, transform_indices = @transform_2, window_bounds = array<i64: 16, 128>}, {pipeline_mode = #tpu.pipeline_mode<synchronous>, transform_indices = @transform_3, window_bounds = array<i64: 32, 128>}, {transform_indices = @transform_4, window_bounds = array<i64: 8, 128>}]} {
    %c0 = arith.constant 0 : index
    %c0_0 = arith.constant 0 : index
    %0 = vector.load %arg1[%c0, %c0_0] : memref<8x16xf32, #tpu.memory_space<vmem>>, vector<8x16xf32>
    %c0_1 = arith.constant 0 : index
    %c0_2 = arith.constant 0 : index
    %1 = vector.load %arg3[%c0_1, %c0_2] : memref<16x128xf32, #tpu.memory_space<vmem>>, vector<16x128xf32>
    %cst = arith.constant dense<0.000000e+00> : vector<8x128xf32>
    %2 = tpu.matmul %0, %1, %cst {dimension_numbers = #tpu.dot_dimension_numbers<[1], [0], [0], [1], [0, 0, 1, 1], [], []>} : vector<8x16xf32>, vector<16x128xf32>, vector<8x128xf32> -> vector<8x128xf32>
    %c0_3 = arith.constant 0 : index
    %c0_4 = arith.constant 0 : index
    %3 = vector.load %arg2[%c0_3, %c0_4] : memref<8x32xf32, #tpu.memory_space<vmem>>, vector<8x32xf32>
    %c0_5 = arith.constant 0 : index
    %c0_6 = arith.constant 0 : index
    %4 = vector.load %arg4[%c0_5, %c0_6] : memref<32x128xf32, #tpu.memory_space<vmem>>, vector<32x128xf32>
    %cst_7 = arith.constant dense<0.000000e+00> : vector<8x128xf32>
    %5 = tpu.matmul %3, %4, %cst_7 {dimension_numbers = #tpu.dot_dimension_numbers<[1], [0], [0], [1], [0, 0, 1, 1], [], []>} : vector<8x32xf32>, vector<32x128xf32>, vector<8x128xf32> -> vector<8x128xf32>
    %6 = arith.addf %2, %5 : vector<8x128xf32>
    %7 = math.tanh %6 : vector<8x128xf32>
    %c0_8 = arith.constant 0 : index
    %c0_9 = arith.constant 0 : index
    %8 = vector.load %arg5[%c0_8, %c0_9] : memref<8x128xf32, #tpu.memory_space<vmem>>, vector<8x128xf32>
    tpu.vector_store %arg5[%c0_8, %c0_9], %7 {strides = array<i32>} : memref<8x128xf32, #tpu.memory_space<vmem>>, vector<8x128xf32>,
    return
  }
  func.func @transform_0(%arg0: i32) -> (i32, i32) {
    %c0_i32 = arith.constant 0 : i32
    %c0_i32_0 = arith.constant 0 : i32
    return %arg0, %c0_i32 : i32, i32
  }
  func.func @transform_1(%arg0: i32) -> (i32, i32) {
    %c0_i32 = arith.constant 0 : i32
    %c0_i32_0 = arith.constant 0 : i32
    return %arg0, %c0_i32 : i32, i32
  }
  func.func @transform_2(%arg0: i32) -> (i32, i32) {
    %c0_i32 = arith.constant 0 : i32
    %c0_i32_0 = arith.constant 0 : i32
    %c0_i32_1 = arith.constant 0 : i32
    return %c0_i32, %c0_i32_0 : i32, i32
  }
  func.func @transform_3(%arg0: i32) -> (i32, i32) {
    %c0_i32 = arith.constant 0 : i32
    %c0_i32_0 = arith.constant 0 : i32
    %c0_i32_1 = arith.constant 0 : i32
    return %c0_i32, %c0_i32_0 : i32, i32
  }
  func.func @transform_4(%arg0: i32) -> (i32, i32) {
    %c0_i32 = arith.constant 0 : i32
    %c0_i32_0 = arith.constant 0 : i32
    return %arg0, %c0_i32 : i32, i32
  }
}

</mosaic_0001>

<bundles_post_ra>
// kernel: tpu_custom_call.1
= control target key start
LH: loop header
LB: loop body
LE: loop exit
PB: predicated region body
PF: predicated region fallthrough
CT: control target
= control target key end

     0   :  { %9 = vsyncpa [#allocation3], 0  ;;  %s507_s0 = inlined_call_operand.hbm [shape: f32[8,16], index: 0, kind: input, shape index: {}]   ;;  %s508_s1 = inlined_call_operand.hbm [shape: f32[8,32], index: 1, kind: input, shape index: {}]   ;;  %s509_s2 = inlined_call_operand.hbm [shape: f32[16,128], index: 2, kind: input, shape index: {}]   ;;  %s510_s3 = inlined_call_operand.hbm [shape: f32[32,128], index: 3, kind: input, shape index: {}]   ;;  %s511_s4 = inlined_call_operand.hbm [shape: f32[8,128], index: 4, kind: output, shape index: {}]  }
   0x1   :  { %10 = vsyncpa [#allocation6], 0 }
   0x2   :  { %11 = vsyncpa [#allocation9], 0 }
   0x3   :  { %12 = vsyncpa [#allocation4], 0  ;;  %s412_s15 = smov [#allocation5]   ;;  %s413_s17 = smov [#allocation2]  }
   0x4   :  { %s29_s16 = sshll.u32 %s412_s15, 4  ;;  %s19_s18 = sshll.u32 %s413_s17, 4  ;;  %s30_s16 = int_to_ptr.vmem [resolvable:$true] %s29_s16  ;;  %s20_s18 = int_to_ptr.vmem [resolvable:$true] %s19_s18 }
   0x5   :  { %s294_s21 = scalar_lea.hbm %s508_s1, 128 }
   0x6   :  { %p295_p0 = scmp.ne.s32.totalorder %s508_s1, %s294_s21  ;;  %p298_p1 = scmp.lt.u32.totalorder %s294_s21, %s508_s1 }
   0x8   :  { %p300_p2 = pnand %p298_p1, %p295_p0 }
   0xa   :  { %303 = shalt.err (!%p300_p2)
}
   0xb   :  { %s304_s26 = scalar_lea.vmem %s30_s16, 128  ;;  %p309_p4 = scmp.lt.s32.totalorder %s30_s16, %s30_s16 }
   0xc   :  { %p305_p3 = scmp.ne.s32.totalorder %s30_s16, %s304_s26  ;;  %p310_p5 = scmp.lt.s32.totalorder %s304_s26, %s304_s26 }
   0xe   :  { %p311_p6 = por %p310_p5, %p309_p4 }
  0x10   :  { %p312_p7 = pnand %p311_p6, %p305_p3 }
  0x12   :  { %315 = shalt.err (!%p312_p7)
}
  0x13   :  { %32 = dma.hbm_to_vmem [thread:$0]  %s508_s1, 128, %s30_s16, [#allocation6]  }
  0x14   :  { %s316_s5 = scalar_lea.hbm %s507_s0, 128 }
  0x15   :  { %p317_p8 = scmp.ne.s32.totalorder %s507_s0, %s316_s5  ;;  %p320_p9 = scmp.lt.u32.totalorder %s316_s5, %s507_s0 }
  0x17   :  { %p322_p10 = pnand %p320_p9, %p317_p8 }
  0x19   :  { %325 = shalt.err (!%p322_p10)
}
  0x1a   :  { %s326_s10 = scalar_lea.vmem %s20_s18, 128  ;;  %p331_p12 = scmp.lt.s32.totalorder %s20_s18, %s20_s18 }
  0x1b   :  { %p327_p11 = scmp.ne.s32.totalorder %s20_s18, %s326_s10  ;;  %p332_p13 = scmp.lt.s32.totalorder %s326_s10, %s326_s10 }
  0x1d   :  { %p333_p0 = por %p332_p13, %p331_p12 }
  0x1f   :  { %p334_p1 = pnand %p333_p0, %p327_p11 }
  0x21   :  { %337 = shalt.err (!%p334_p1)
}
  0x22   :  { %22 = dma.hbm_to_vmem [thread:$0]  %s507_s0, 128, %s20_s18, [#allocation3]  }
  0x23   :  { %s414_s12 = smov [#allocation7]   ;;  %s338_s16 = scalar_lea.hbm %s509_s2, 256 }
  0x24   :  { %s38_s13 = sshll.u32 %s414_s12, 4  ;;  %p339_p2 = scmp.ne.s32.totalorder %s509_s2, %s338_s16  ;;  %s39_s13 = int_to_ptr.vmem [resolvable:$true] %s38_s13 }
  0x25   :  { %p342_p3 = scmp.lt.u32.totalorder %s338_s16, %s509_s2 }
  0x27   :  { %p344_p4 = pnand %p342_p3, %p339_p2 }
  0x29   :  { %347 = shalt.err (!%p344_p4)
}
  0x2a   :  { %s348_s22 = scalar_lea.vmem %s39_s13, 256  ;;  %p353_p6 = scmp.lt.s32.totalorder %s39_s13, %s39_s13 }
  0x2b   :  { %p349_p5 = scmp.ne.s32.totalorder %s39_s13, %s348_s22  ;;  %p354_p7 = scmp.lt.s32.totalorder %s348_s22, %s348_s22 }
  0x2d   :  { %p355_p8 = por %p354_p7, %p353_p6 }
  0x2f   :  { %p356_p9 = pnand %p355_p8, %p349_p5 }
  0x31   :  { %359 = shalt.err (!%p356_p9)
}
  0x32   :  { %s415_s0 = smov 128   ;;  %s416_s18 = smov 8  }
  0x33   :  { %44 = dma.hbm_to_vmem [thread:$0]  %s509_s2, 256, %s39_s13, [#allocation6], %s415_s0, %s415_s0, %s416_s18  }
  0x34   :  { %s417_s25 = smov [#allocation8]   ;;  %s360_s29 = scalar_lea.hbm %s510_s3, 512 }
  0x35   :  { %s50_s26 = sshll.u32 %s417_s25, 4  ;;  %p361_p10 = scmp.ne.s32.totalorder %s510_s3, %s360_s29  ;;  %s51_s26 = int_to_ptr.vmem [resolvable:$true] %s50_s26 }
  0x36   :  { %p364_p11 = scmp.lt.u32.totalorder %s360_s29, %s510_s3 }
  0x38   :  { %p366_p12 = pnand %p364_p11, %p361_p10 }
  0x3a   :  { %369 = shalt.err (!%p366_p12)
}
  0x3b   :  { %s370_s8 = scalar_lea.vmem %s51_s26, 512  ;;  %p375_p0 = scmp.lt.s32.totalorder %s51_s26, %s51_s26 }
  0x3c   :  { %p371_p13 = scmp.ne.s32.totalorder %s51_s26, %s370_s8  ;;  %p376_p1 = scmp.lt.s32.totalorder %s370_s8, %s370_s8 }
  0x3e   :  { %p377_p2 = por %p376_p1, %p375_p0 }
  0x40   :  { %p378_p3 = pnand %p377_p2, %p371_p13 }
  0x42   :  { %381 = shalt.err (!%p378_p3)
}
  0x43   :  { %56 = dma.hbm_to_vmem [thread:$0]  %s510_s3, 512, %s51_s26, [#allocation9], %s415_s0, %s415_s0, %s416_s18  }
  0x44   :  { %404 = dma.done.wait [#allocation3], 128  }
  0x45   :  { %405 = vsyncadd [#allocation3], 4294967168 }
  0x46   :  { %406 = dma.done.wait [#allocation6], 384  }
  0x47   :  { %407 = vsyncadd [#allocation6], 4294966912 }
  0x48   :  { %408 = dma.done.wait [#allocation9], 512  }
  0x49   :  { %409 = vsyncadd [#allocation9], 4294966784  ;;  %v418_v0 = vmov 0.0|0.0   ;;  %vm419_vm0 = vmmov 0   ;;  %v420_v1 = vmov 0.0   ;;  %v73_v2 = vld [vmem:[#allocation8] sm:$0xff] }
  0x4a   :  { %272 = vmatprep.subr.bf16.mxu1 %v418_v0  ;;  %278 = vmatprep.subr.bf16.mxu0 %v418_v0  ;;  %v74_v3 = vld [vmem:[#allocation8 + $0x8] sm:$0xff]  ;;  %v70_v4 = vld [vmem:[#allocation7] sm:$0xff]  ;;  %v71_v6 = vld [vmem:[#allocation7 + $0x8] sm:$0xff]  ;;  %vm151_vm1 = vcmask 130048   ;;  %vm77_vm2 = vcmask 261120   ;;  %s421_s3 = smov [#allocation10]  }
  0x4b   :  { %269 = vmatprep.mubr.msk.f32.mxu0 %vm419_vm0, %v420_v1  ;;  %262 = vmatprep.mubr.msk.f32.mxu1 %vm419_vm0, %v420_v1  ;;  %v273_v5 = vpack.c.bf16 %v74_v3, %v73_v2  ;;  %v75_v7 = vld [vmem:[#allocation8 + $0x10] sm:$0xff]  ;;  %v76_v8 = vld [vmem:[#allocation8 + $0x18] sm:$0xff]  ;;  %v279_v9 = vpack.c.bf16 %v71_v6, %v70_v4  ;;  %v69_v11 = vld [vmem:[#allocation2] sm:$0xff]  ;;  %s233_s10 = sshll.u32 %s421_s3, 4  ;;  %s234_s10 = int_to_ptr.vmem [resolvable:$true] %s233_s10 }
  0x4c   :  { %v276_v10 = vpack.c.bf16 %v76_v8, %v75_v7  ;;  %v72_v12 = vld [vmem:[#allocation5] sm:$0xff]  ;;  %s382_s1 = scalar_lea.vmem %s234_s10, 128  ;;  %p387_p5 = scmp.lt.s32.totalorder %s234_s10, %s234_s10 }
  0x4d   :  { %274 = vmatpush3.bf16.msra.mxu1 %v273_v5  ;;  %280 = vmatpush3.bf16.msra.mxu0 %v279_v9  ;;  %p383_p4 = scmp.ne.s32.totalorder %s234_s10, %s382_s1  ;;  %p388_p6 = scmp.lt.s32.totalorder %s382_s1, %s382_s1 }
  0x4e   :  { %275 = vmatprep.subr.bf16.mxu1 %v418_v0 }
  0x4f   :  { %p389_p7 = por %p388_p6, %p387_p5 }
  0x50   :  { %270 = vmatmul.mubr.msk.f32.vlgmr.msra.gmra.mrb[0].mxu0 %vm151_vm1, %v69_v11 }
  0x51   :  { %277 = vmatpush3.bf16.msra.mxu1 %v276_v10  ;;  %p390_p8 = pnand %p389_p7, %p383_p4 }
  0x54   :  { %263 = vmatmul.mubr.msk.f32.vlgmr.msra.gmra.mrb[0].mxu1 %vm77_vm2, %v72_v12 }
 0x123   :  { %v221_v13 = vpop.f32.mrb[0].mxu0 }
 0x124   :  { %v271_v14 = vpop.f32.mrb[1].mxu0 }
 0x127   :  { %v147_v15 = vpop.f32.mrb[0].mxu1 }
 0x128   :  { %v222_v16 = vadd.f32 %v221_v13, %v147_v15  ;;  %v264_v17 = vpop.f32.mrb[1].mxu1 }
 0x12a   :  { %292 = vtanh.f32 %v222_v16 }
 0x134   :  { %v293_v18 = vpop.eup %292 }
 0x135   :  { %226 = vst [vmem:[#allocation10] sm:$0xff] %v293_v18 }
 0x136   :  { %393 = shalt.err (!%p390_p8)
}
 0x137   :  { %s394_s13 = scalar_lea.hbm %s511_s4, 128 }
 0x138   :  { %p395_p9 = scmp.ne.s32.totalorder %s511_s4, %s394_s13  ;;  %p398_p10 = scmp.lt.u32.totalorder %s394_s13, %s511_s4 }
 0x13a   :  { %p400_p11 = pnand %p398_p10, %p395_p9 }
 0x13c   :  { %403 = shalt.err (!%p400_p11)
}
 0x13d   :  { %236 = dma.vmem_to_hbm [thread:$0]  %s234_s10, 128, %s511_s4, [#allocation4]  }
 0x13e   :  { %410 = dma.done.wait [#allocation4], 128  }
 0x13f   :  { %411 = vsyncadd [#allocation4], 4294967168 }
 0x140   :  { %240 = vsyncpa [#allocation3], 1 }
 0x141   :  { %241 = vsyncpa [#allocation6], 1 }
 0x142   :  { %242 = vsyncpa [#allocation9], 1 }
 0x143   :  { %243 = vsyncpa [#allocation4], 1 }

// kernel: tpu_custom_call.1
= control target key start
LH: loop header
LB: loop body
LE: loop exit
PB: predicated region body
PF: predicated region fallthrough
CT: control target
= control target key end

     0   :  { %9 = vsyncpa [#allocation3], 0  ;;  %s507_s0 = inlined_call_operand.hbm [shape: f32[8,16], index: 0, kind: input, shape index: {}]   ;;  %s508_s1 = inlined_call_operand.hbm [shape: f32[8,32], index: 1, kind: input, shape index: {}]   ;;  %s509_s2 = inlined_call_operand.hbm [shape: f32[16,128], index: 2, kind: input, shape index: {}]   ;;  %s510_s3 = inlined_call_operand.hbm [shape: f32[32,128], index: 3, kind: input, shape index: {}]   ;;  %s511_s4 = inlined_call_operand.hbm [shape: f32[8,128], index: 4, kind: output, shape index: {}]  }
   0x1   :  { %10 = vsyncpa [#allocation6], 0 }
   0x2   :  { %11 = vsyncpa [#allocation9], 0 }
   0x3   :  { %12 = vsyncpa [#allocation4], 0  ;;  %s412_s15 = smov [#allocation5]   ;;  %s413_s17 = smov [#allocation2]  }
   0x4   :  { %s29_s16 = sshll.u32 %s412_s15, 4  ;;  %s19_s18 = sshll.u32 %s413_s17, 4  ;;  %s30_s16 = int_to_ptr.vmem [resolvable:$true] %s29_s16  ;;  %s20_s18 = int_to_ptr.vmem [resolvable:$true] %s19_s18 }
   0x5   :  { %s294_s21 = scalar_lea.hbm %s508_s1, 128 }
   0x6   :  { %p295_p0 = scmp.ne.s32.totalorder %s508_s1, %s294_s21  ;;  %p298_p1 = scmp.lt.u32.totalorder %s294_s21, %s508_s1 }
   0x8   :  { %p300_p2 = pnand %p298_p1, %p295_p0 }
   0xa   :  { %303 = shalt.err (!%p300_p2)
}
   0xb   :  { %s304_s26 = scalar_lea.vmem %s30_s16, 128  ;;  %p309_p4 = scmp.lt.s32.totalorder %s30_s16, %s30_s16 }
   0xc   :  { %p305_p3 = scmp.ne.s32.totalorder %s30_s16, %s304_s26  ;;  %p310_p5 = scmp.lt.s32.totalorder %s304_s26, %s304_s26 }
   0xe   :  { %p311_p6 = por %p310_p5, %p309_p4 }
  0x10   :  { %p312_p7 = pnand %p311_p6, %p305_p3 }
  0x12   :  { %315 = shalt.err (!%p312_p7)
}
  0x13   :  { %32 = dma.hbm_to_vmem [thread:$0]  %s508_s1, 128, %s30_s16, [#allocation6]  }
  0x14   :  { %s316_s5 = scalar_lea.hbm %s507_s0, 128 }
  0x15   :  { %p317_p8 = scmp.ne.s32.totalorder %s507_s0, %s316_s5  ;;  %p320_p9 = scmp.lt.u32.totalorder %s316_s5, %s507_s0 }
  0x17   :  { %p322_p10 = pnand %p320_p9, %p317_p8 }
  0x19   :  { %325 = shalt.err (!%p322_p10)
}
  0x1a   :  { %s326_s10 = scalar_lea.vmem %s20_s18, 128  ;;  %p331_p12 = scmp.lt.s32.totalorder %s20_s18, %s20_s18 }
  0x1b   :  { %p327_p11 = scmp.ne.s32.totalorder %s20_s18, %s326_s10  ;;  %p332_p13 = scmp.lt.s32.totalorder %s326_s10, %s326_s10 }
  0x1d   :  { %p333_p0 = por %p332_p13, %p331_p12 }
  0x1f   :  { %p334_p1 = pnand %p333_p0, %p327_p11 }
  0x21   :  { %337 = shalt.err (!%p334_p1)
}
  0x22   :  { %22 = dma.hbm_to_vmem [thread:$0]  %s507_s0, 128, %s20_s18, [#allocation3]  }
  0x23   :  { %s414_s12 = smov [#allocation7]   ;;  %s338_s16 = scalar_lea.hbm %s509_s2, 256 }
  0x24   :  { %s38_s13 = sshll.u32 %s414_s12, 4  ;;  %p339_p2 = scmp.ne.s32.totalorder %s509_s2, %s338_s16  ;;  %s39_s13 = int_to_ptr.vmem [resolvable:$true] %s38_s13 }
  0x25   :  { %p342_p3 = scmp.lt.u32.totalorder %s338_s16, %s509_s2 }
  0x27   :  { %p344_p4 = pnand %p342_p3, %p339_p2 }
  0x29   :  { %347 = shalt.err (!%p344_p4)
}
  0x2a   :  { %s348_s22 = scalar_lea.vmem %s39_s13, 256  ;;  %p353_p6 = scmp.lt.s32.totalorder %s39_s13, %s39_s13 }
  0x2b   :  { %p349_p5 = scmp.ne.s32.totalorder %s39_s13, %s348_s22  ;;  %p354_p7 = scmp.lt.s32.totalorder %s348_s22, %s348_s22 }
  0x2d   :  { %p355_p8 = por %p354_p7, %p353_p6 }
  0x2f   :  { %p356_p9 = pnand %p355_p8, %p349_p5 }
  0x31   :  { %359 = shalt.err (!%p356_p9)
}
  0x32   :  { %s415_s0 = smov 128   ;;  %s416_s18 = smov 8  }
  0x33   :  { %44 = dma.hbm_to_vmem [thread:$0]  %s509_s2, 256, %s39_s13, [#allocation6], %s415_s0, %s415_s0, %s416_s18  }
  0x34   :  { %s417_s25 = smov [#allocation8]   ;;  %s360_s29 = scalar_lea.hbm %s510_s3, 512 }
  0x35   :  { %s50_s26 = sshll.u32 %s417_s25, 4  ;;  %p361_p10 = scmp.ne.s32.totalorder %s510_s3, %s360_s29  ;;  %s51_s26 = int_to_ptr.vmem [resolvable:$true] %s50_s26 }
  0x36   :  { %p364_p11 = scmp.lt.u32.totalorder %s360_s29, %s510_s3 }
  0x38   :  { %p366_p12 = pnand %p364_p11, %p361_p10 }
  0x3a   :  { %369 = shalt.err (!%p366_p12)
}
  0x3b   :  { %s370_s8 = scalar_lea.vmem %s51_s26, 512  ;;  %p375_p0 = scmp.lt.s32.totalorder %s51_s26, %s51_s26 }
  0x3c   :  { %p371_p13 = scmp.ne.s32.totalorder %s51_s26, %s370_s8  ;;  %p376_p1 = scmp.lt.s32.totalorder %s370_s8, %s370_s8 }
  0x3e   :  { %p377_p2 = por %p376_p1, %p375_p0 }
  0x40   :  { %p378_p3 = pnand %p377_p2, %p371_p13 }
  0x42   :  { %381 = shalt.err (!%p378_p3)
}
  0x43   :  { %56 = dma.hbm_to_vmem [thread:$0]  %s510_s3, 512, %s51_s26, [#allocation9], %s415_s0, %s415_s0, %s416_s18  }
  0x44   :  { %404 = dma.done.wait [#allocation3], 128  }
  0x45   :  { %405 = vsyncadd [#allocation3], 4294967168 }
  0x46   :  { %406 = dma.done.wait [#allocation6], 384  }
  0x47   :  { %407 = vsyncadd [#allocation6], 4294966912 }
  0x48   :  { %408 = dma.done.wait [#allocation9], 512  }
  0x49   :  { %409 = vsyncadd [#allocation9], 4294966784  ;;  %v418_v0 = vmov 0.0|0.0   ;;  %vm419_vm0 = vmmov 0   ;;  %v420_v1 = vmov 0.0   ;;  %v73_v2 = vld [vmem:[#allocation8] sm:$0xff] }
  0x4a   :  { %272 = vmatprep.subr.bf16.mxu1 %v418_v0  ;;  %278 = vmatprep.subr.bf16.mxu0 %v418_v0  ;;  %v74_v3 = vld [vmem:[#allocation8 + $0x8] sm:$0xff]  ;;  %v70_v4 = vld [vmem:[#allocation7] sm:$0xff]  ;;  %v71_v6 = vld [vmem:[#allocation7 + $0x8] sm:$0xff]  ;;  %vm151_vm1 = vcmask 130048   ;;  %vm77_vm2 = vcmask 261120   ;;  %s421_s3 = smov [#allocation10]  }
  0x4b   :  { %269 = vmatprep.mubr.msk.f32.mxu0 %vm419_vm0, %v420_v1  ;;  %262 = vmatprep.mubr.msk.f32.mxu1 %vm419_vm0, %v420_v1  ;;  %v273_v5 = vpack.c.bf16 %v74_v3, %v73_v2  ;;  %v75_v7 = vld [vmem:[#allocation8 + $0x10] sm:$0xff]  ;;  %v76_v8 = vld [vmem:[#allocation8 + $0x18] sm:$0xff]  ;;  %v279_v9 = vpack.c.bf16 %v71_v6, %v70_v4  ;;  %v69_v11 = vld [vmem:[#allocation2] sm:$0xff]  ;;  %s233_s10 = sshll.u32 %s421_s3, 4  ;;  %s234_s10 = int_to_ptr.vmem [resolvable:$true] %s233_s10 }
  0x4c   :  { %v276_v10 = vpack.c.bf16 %v76_v8, %v75_v7  ;;  %v72_v12 = vld [vmem:[#allocation5] sm:$0xff]  ;;  %s382_s1 = scalar_lea.vmem %s234_s10, 128  ;;  %p387_p5 = scmp.lt.s32.totalorder %s234_s10, %s234_s10 }
  0x4d   :  { %274 = vmatpush3.bf16.msra.mxu1 %v273_v5  ;;  %280 = vmatpush3.bf16.msra.mxu0 %v279_v9  ;;  %p383_p4 = scmp.ne.s32.totalorder %s234_s10, %s382_s1  ;;  %p388_p6 = scmp.lt.s32.totalorder %s382_s1, %s382_s1 }
  0x4e   :  { %275 = vmatprep.subr.bf16.mxu1 %v418_v0 }
  0x4f   :  { %p389_p7 = por %p388_p6, %p387_p5 }
  0x50   :  { %270 = vmatmul.mubr.msk.f32.vlgmr.msra.gmra.mrb[0].mxu0 %vm151_vm1, %v69_v11 }
  0x51   :  { %277 = vmatpush3.bf16.msra.mxu1 %v276_v10  ;;  %p390_p8 = pnand %p389_p7, %p383_p4 }
  0x54   :  { %263 = vmatmul.mubr.msk.f32.vlgmr.msra.gmra.mrb[0].mxu1 %vm77_vm2, %v72_v12 }
 0x123   :  { %v221_v13 = vpop.f32.mrb[0].mxu0 }
 0x124   :  { %v271_v14 = vpop.f32.mrb[1].mxu0 }
 0x127   :  { %v147_v15 = vpop.f32.mrb[0].mxu1 }
 0x128   :  { %v222_v16 = vadd.f32 %v221_v13, %v147_v15  ;;  %v264_v17 = vpop.f32.mrb[1].mxu1 }
 0x12a   :  { %292 = vtanh.f32 %v222_v16 }
 0x134   :  { %v293_v18 = vpop.eup %292 }
 0x135   :  { %226 = vst [vmem:[#allocation10] sm:$0xff] %v293_v18 }
 0x136   :  { %393 = shalt.err (!%p390_p8)
}
 0x137   :  { %s394_s13 = scalar_lea.hbm %s511_s4, 128 }
 0x138   :  { %p395_p9 = scmp.ne.s32.totalorder %s511_s4, %s394_s13  ;;  %p398_p10 = scmp.lt.u32.totalorder %s394_s13, %s511_s4 }
 0x13a   :  { %p400_p11 = pnand %p398_p10, %p395_p9 }
 0x13c   :  { %403 = shalt.err (!%p400_p11)
}
 0x13d   :  { %236 = dma.vmem_to_hbm [thread:$0]  %s234_s10, 128, %s511_s4, [#allocation4]  }
 0x13e   :  { %410 = dma.done.wait [#allocation4], 128  }
 0x13f   :  { %411 = vsyncadd [#allocation4], 4294967168 }
 0x140   :  { %240 = vsyncpa [#allocation3], 1 }
 0x141   :  { %241 = vsyncpa [#allocation6], 1 }
 0x142   :  { %242 = vsyncpa [#allocation9], 1 }
 0x143   :  { %243 = vsyncpa [#allocation4], 1 }

</bundles_post_ra>
